<compile_context>
chip_gen: v5e
topology: v5e:2x2
jax: 0.10.0
libtpu: 0.0.40
codegen_flags: <defaults>
</compile_context>

<pallas_src>
import functools

import jax
import jax.numpy as jnp
from jax import lax
from jax.experimental import pallas as pl
from jax.experimental.pallas import tpu as pltpu

PRIMITIVES = [0.5, 0.6, 0.7, 0.8, 0.9, 1.0]
N_OPS = len(PRIMITIVES)

# tap order t = (dy+1)*3 + (dx+1)  <->  conv kernel position (kh, kw) = (dy+1, dx+1)
TAP_OFFSETS = [(dy, dx) for dy in (-1, 0, 1) for dx in (-1, 0, 1)]


# ----------------------------------------------------------------------------
# SearchController channel-set construction (matches the PyTorch controller)
# ----------------------------------------------------------------------------
def channel_constraints(channels_num, max_num, factor=4):
    remainder = channels_num % factor
    if remainder * 2 > factor:
        channels_num += factor - remainder
    else:
        channels_num -= remainder
    channels_num = min(max(channels_num, factor), max_num)
    return channels_num


def init_channel_options(channels_num, pruning_rate):
    opts = []
    for op in PRIMITIVES:
        c = int(channels_num * (1.0 - pruning_rate) * op)
        opts.append(channel_constraints(c, channels_num))
    return opts


def soft_channel_mask(alpha, channel_options, cin):
    """softmax(alpha)-weighted mix of 'first c channels' binary masks -> (cin,)."""
    p = jax.nn.softmax(jnp.reshape(alpha, (-1,)).astype(jnp.float32), axis=-1)
    idx = jnp.arange(cin)[None, :]
    copt = jnp.asarray(channel_options, jnp.int32)[:, None]
    bin_masks = (idx < copt).astype(jnp.float32)        # (N_OPS, cin)
    return p @ bin_masks                                 # (cin,)


# ----------------------------------------------------------------------------
# Fused Pallas kernel: head conv + searched body convs + tail conv, one image
# per grid step, activations resident in VMEM in (C, H*W) layout.
# ----------------------------------------------------------------------------
def fused_search_kernel(mask_ref, lr_ref, hw_ref, hb_ref, bw_ref, bb_ref,
                        tw_ref, tb_ref, out_ref, *, n_layers, height, width):
    m = height * width

    def stacked_taps(x):
        # x: (cin, m) f32 -> (9*cin, m) bf16.
        # Row block t holds x cyclically rolled so that column p sees neighbour
        # (p + dy*width + dx); wrapped (out-of-image) pixels are zeroed by ONE
        # multiply with the pre-broadcast 0/1 boundary mask, then a single bf16
        # cast feeds the MXU.
        pieces = []
        for dy, dx in TAP_OFFSETS:
            off = dy * width + dx
            if off == 0:
                pieces.append(x)
            else:
                # shifted[:, p] = x[:, (p + off) % m]  ==  jnp.roll(x, -off, 1)
                pieces.append(pltpu.roll(x, shift=(-off) % m, axis=1))
        stk = jnp.concatenate(pieces, axis=0) * mask_ref[...]     # f32, 1 multiply
        return stk.astype(jnp.bfloat16)                           # 1 cast per conv

    def conv3x3(x, w_bf16, b_f32, relu):
        # Single MXU matmul, K = 9*cin (vs 9 tiny K=cin matmuls before).
        y = jnp.dot(w_bf16, stacked_taps(x),
                    preferred_element_type=jnp.float32) + b_f32
        return jnp.maximum(y, 0.0) if relu else y

    # head conv: (zero-padded) colors -> features
    x = conv3x3(lr_ref[0], hw_ref[...], hb_ref[...], relu=True)

    # searched body convs (alpha-softmax channel mask already folded into bw)
    def body_fn(l, x):
        return conv3x3(x, bw_ref[l], bb_ref[l], relu=True)

    x = lax.fori_loop(0, n_layers, body_fn, x)

    # tail conv: features -> (zero-padded) colors, no relu
    sr = conv3x3(x, tw_ref[...], tb_ref[...], relu=False)
    out_ref[...] = sr[None].astype(out_ref.dtype)


# ----------------------------------------------------------------------------
# Wrapper: fold alpha softmax + channel masks into weights, stack taps, call.
# ----------------------------------------------------------------------------
def _stack_weight(w_oihw):
    """(O, I, 3, 3) -> (O, 9*I); columns tap-major / in-channel-minor, matching
    the row order of the stacked input built in-kernel."""
    o, i = w_oihw.shape[0], w_oihw.shape[1]
    taps = jnp.transpose(w_oihw, (2, 3, 0, 1)).reshape(9, o, i)   # t = kh*3+kw
    return jnp.transpose(taps, (1, 0, 2)).reshape(o, 9 * i)


def _tap_boundary_masks(height, width):
    """(9, H*W): validity of neighbour (h+dy, w+dx) per tap (SAME zero pad)."""
    h = jnp.arange(height)[:, None]
    w = jnp.arange(width)[None, :]
    rows = []
    for dy, dx in TAP_OFFSETS:
        ok = ((h + dy >= 0) & (h + dy < height)
              & (w + dx >= 0) & (w + dx < width))
        rows.append(ok.reshape(-1))
    return jnp.stack(rows, 0).astype(jnp.float32)


def search_controller_forward(lr, head_w, head_b, body_ws, body_bs, alphas,
                              tail_w, tail_b, *, channel_sets):
    """lr: (N, n_colors, H, W) NCHW (PyTorch layout). Returns (sr, sr2lr)."""
    n, n_colors, height, width = lr.shape
    m = height * width
    cin = head_w.shape[0]
    n_out = tail_w.shape[0]
    n_layers = len(body_ws)
    assert n_colors <= cin, "feature width must be >= number of colors"
    out_pad = ((n_out + 7) // 8) * 8          # full-sublane (unmasked) stores

    # Fold softmax(alpha) soft channel mask into the searched conv weights once,
    # outside the kernel: (x * mask) @ W == x @ (mask * W). Stack taps so each
    # conv becomes a single K = 9*Cin matmul.
    hw_pad = jnp.pad(head_w, ((0, 0), (0, cin - n_colors), (0, 0), (0, 0)))
    hw = _stack_weight(hw_pad).astype(jnp.bfloat16)                 # (cin, 9*cin)
    bw = jnp.stack(
        [_stack_weight(body_ws[l]
                       * soft_channel_mask(alphas[l], channel_sets[l], cin)
                       [None, :, None, None])
         for l in range(n_layers)], 0).astype(jnp.bfloat16)          # (L, cin, 9*cin)
    tw_pad = jnp.pad(tail_w, ((0, out_pad - n_out), (0, 0), (0, 0), (0, 0)))
    tw = _stack_weight(tw_pad).astype(jnp.bfloat16)                  # (out_pad, 9*cin)

    hb = head_b.reshape(cin, 1).astype(jnp.float32)
    bb = jnp.stack([b.reshape(cin, 1) for b in body_bs], 0).astype(jnp.float32)
    tb = jnp.pad(tail_b, (0, out_pad - n_out)).reshape(out_pad, 1).astype(jnp.float32)

    # Boundary masks pre-broadcast in the wrapper to the stacked row layout
    # (9*cin, m): no broadcast_in_dim inside the kernel, one multiply per conv.
    masks = jnp.repeat(_tap_boundary_masks(height, width), cin,
                       axis=0).astype(jnp.float32)                   # (9*cin, m)

    lr_flat = jnp.pad(lr.reshape(n, n_colors, m).astype(jnp.float32),
                      ((0, 0), (0, cin - n_colors), (0, 0)))          # (n, cin, m)

    kernel = functools.partial(fused_search_kernel, n_layers=n_layers,
                               height=height, width=width)
    sr_flat = pl.pallas_call(
        kernel,
        out_shape=jax.ShapeDtypeStruct((n, out_pad, m), jnp.float32),
        grid_spec=pltpu.PrefetchScalarGridSpec(
            num_scalar_prefetch=0,
            grid=(n,),                                   # one image per grid step
            in_specs=[
                pl.BlockSpec((9 * cin, m), lambda i: (0, 0)),          # tap masks
                pl.BlockSpec((1, cin, m), lambda i: (i, 0, 0)),        # lr (padded)
                pl.BlockSpec((cin, 9 * cin), lambda i: (0, 0)),        # head W
                pl.BlockSpec((cin, 1), lambda i: (0, 0)),              # head b
                pl.BlockSpec((n_layers, cin, 9 * cin),
                             lambda i: (0, 0, 0)),                     # body W (masked)
                pl.BlockSpec((n_layers, cin, 1), lambda i: (0, 0, 0)), # body b
                pl.BlockSpec((out_pad, 9 * cin), lambda i: (0, 0)),    # tail W
                pl.BlockSpec((out_pad, 1), lambda i: (0, 0)),          # tail b
            ],
            out_specs=pl.BlockSpec((1, out_pad, m), lambda i: (i, 0, 0)),
        ),
        compiler_params=pltpu.CompilerParams(
            dimension_semantics=("parallel",),           # megacore over batch
            vmem_limit_bytes=64 * 1024 * 1024,
        ),
    )(masks, lr_flat, hw, hb, bw, bb, tw, tb)

    sr = sr_flat[:, :n_out, :].reshape(n, n_out, height, width)
    # TODO(synk): DRN dual-regression branch (sr2lr) is not in the provided
    # SearchController source; returning None for it.
    return sr, None


# ----------------------------------------------------------------------------
# Pure-JAX references (PyTorch semantics). quantize_bf16=True mirrors the
# kernel's bf16 rounding of activations / folded weights for a tight check.
# ----------------------------------------------------------------------------
def reference_forward(lr, head_w, head_b, body_ws, body_bs, alphas, tail_w,
                      tail_b, *, channel_sets, quantize_bf16=False):
    dn = ('NCHW', 'OIHW', 'NCHW')
    conv = lambda x, w: lax.conv_general_dilated(x, w, (1, 1), 'SAME',
                                                 dimension_numbers=dn)
    q = ((lambda a: a.astype(jnp.bfloat16).astype(jnp.float32))
         if quantize_bf16 else (lambda a: a))
    cin = head_w.shape[0]
    x = jnp.maximum(conv(q(lr), q(head_w)) + head_b.reshape(1, -1, 1, 1), 0.0)
    for l in range(len(body_ws)):
        cmask = soft_channel_mask(alphas[l], channel_sets[l], cin)
        wq = q(body_ws[l] * cmask[None, :, None, None])
        x = jnp.maximum(conv(q(x), wq) + body_bs[l].reshape(1, -1, 1, 1), 0.0)
    return conv(q(x), q(tail_w)) + tail_b.reshape(1, -1, 1, 1)


# ----------------------------------------------------------------------------
if __name__ == "__main__":
    N, H, W = 2, 16, 16
    n_colors, cin, n_layers = 3, 16, 4
    pruning_rate = 0.0

    channel_sets = [init_channel_options(cin, pruning_rate)
                    for _ in range(n_layers)]

    key = jax.random.PRNGKey(0)
    key, k_lr, k_hw, k_hb, k_tw, k_tb = jax.random.split(key, 6)
    lr = jax.random.normal(k_lr, (N, n_colors, H, W), jnp.float32)
    head_w = 0.05 * jax.random.normal(k_hw, (cin, n_colors, 3, 3), jnp.float32)
    head_b = 0.01 * jax.random.normal(k_hb, (cin,), jnp.float32)
    tail_w = 0.05 * jax.random.normal(k_tw, (n_colors, cin, 3, 3), jnp.float32)
    tail_b = 0.01 * jax.random.normal(k_tb, (n_colors,), jnp.float32)

    body_ws, body_bs, alphas = [], [], []
    for _ in range(n_layers):
        key, k_w, k_b, k_a = jax.random.split(key, 4)
        body_ws.append(0.05 * jax.random.normal(k_w, (cin, cin, 3, 3), jnp.float32))
        body_bs.append(0.01 * jax.random.normal(k_b, (cin,), jnp.float32))
        alphas.append(0.001 * jax.random.normal(k_a, (N_OPS,), jnp.float32))

    fwd = jax.jit(functools.partial(search_controller_forward,
                                    channel_sets=channel_sets))
    sr, _ = fwd(lr, head_w, head_b, body_ws, body_bs, alphas, tail_w, tail_b)
    jax.block_until_ready(sr)
    assert sr.shape == (N, n_colors, H, W)

    # exact f32 reference (PyTorch semantics)
    sr_ref = reference_forward(lr, head_w, head_b, body_ws, body_bs, alphas,
                               tail_w, tail_b, channel_sets=channel_sets)
    # bf16-quantization-matched reference (tight check of the MXU path)
    sr_ref_q = reference_forward(lr, head_w, head_b, body_ws, body_bs, alphas,
                                 tail_w, tail_b, channel_sets=channel_sets,
                                 quantize_bf16=True)
    err_f32 = float(jnp.max(jnp.abs(sr - sr_ref)))
    err_q = float(jnp.max(jnp.abs(sr - sr_ref_q)))
    if not (err_q < 5e-3 and err_f32 < 2e-2):
        raise RuntimeError(
            f"Pallas kernel mismatch: bf16-matched err={err_q}, f32 err={err_f32}")
    print("KERNEL_OK")
</pallas_src>

<mosaic_0001>
module attributes {stable_mosaic.version = 11 : i64} {
  func.func @fused_search_kernel(%arg0: i32, %arg1: memref<144x256xf32, #tpu.memory_space<vmem>>, %arg2: memref<1x16x256xf32, #tpu.memory_space<vmem>>, %arg3: memref<16x144xbf16, #tpu.memory_space<vmem>>, %arg4: memref<16x1xf32, #tpu.memory_space<vmem>>, %arg5: memref<4x16x144xbf16, #tpu.memory_space<vmem>>, %arg6: memref<4x16x1xf32, #tpu.memory_space<vmem>>, %arg7: memref<8x144xbf16, #tpu.memory_space<vmem>>, %arg8: memref<8x1xf32, #tpu.memory_space<vmem>>, %arg9: memref<1x8x256xf32, #tpu.memory_space<vmem>>) attributes {dimension_semantics = [#tpu.dimension_semantics<parallel>], iteration_bounds = array<i64: 2>, scalar_prefetch = 0 : i64, scratch_operands = 0 : i64, tpu.core_type = #tpu.core_type<tc>, window_params = [{pipeline_mode = #tpu.pipeline_mode<synchronous>, transform_indices = @transform_0, window_bounds = array<i64: 144, 256>}, {transform_indices = @transform_1, window_bounds = array<i64: 1, 16, 256>}, {pipeline_mode = #tpu.pipeline_mode<synchronous>, transform_indices = @transform_2, window_bounds = array<i64: 16, 144>}, {pipeline_mode = #tpu.pipeline_mode<synchronous>, transform_indices = @transform_3, window_bounds = array<i64: 16, 1>}, {pipeline_mode = #tpu.pipeline_mode<synchronous>, transform_indices = @transform_4, window_bounds = array<i64: 4, 16, 144>}, {pipeline_mode = #tpu.pipeline_mode<synchronous>, transform_indices = @transform_5, window_bounds = array<i64: 4, 16, 1>}, {pipeline_mode = #tpu.pipeline_mode<synchronous>, transform_indices = @transform_6, window_bounds = array<i64: 8, 144>}, {pipeline_mode = #tpu.pipeline_mode<synchronous>, transform_indices = @transform_7, window_bounds = array<i64: 8, 1>}, {transform_indices = @transform_8, window_bounds = array<i64: 1, 8, 256>}]} {
    %c0 = arith.constant 0 : index
    %c0_0 = arith.constant 0 : index
    %c0_1 = arith.constant 0 : index
    %0 = vector.load %arg2[%c0, %c0_0, %c0_1] : memref<1x16x256xf32, #tpu.memory_space<vmem>>, vector<1x16x256xf32>
    %1 = vector.shape_cast %0 : vector<1x16x256xf32> to vector<16x256xf32>
    %c0_2 = arith.constant 0 : index
    %c0_3 = arith.constant 0 : index
    %2 = vector.load %arg3[%c0_2, %c0_3] : memref<16x144xbf16, #tpu.memory_space<vmem>>, vector<16x144xbf16>
    %c0_4 = arith.constant 0 : index
    %c0_5 = arith.constant 0 : index
    %3 = vector.load %arg4[%c0_4, %c0_5] : memref<16x1xf32, #tpu.memory_space<vmem>>, vector<16x1xf32>
    %c17_i32 = arith.constant 17 : i32
    %4 = tpu.dynamic_rotate %1 by %c17_i32 dim 1 : vector<16x256xf32>, i32 -> vector<16x256xf32>
    %c16_i32 = arith.constant 16 : i32
    %5 = tpu.dynamic_rotate %1 by %c16_i32 dim 1 : vector<16x256xf32>, i32 -> vector<16x256xf32>
    %c15_i32 = arith.constant 15 : i32
    %6 = tpu.dynamic_rotate %1 by %c15_i32 dim 1 : vector<16x256xf32>, i32 -> vector<16x256xf32>
    %c1_i32 = arith.constant 1 : i32
    %7 = tpu.dynamic_rotate %1 by %c1_i32 dim 1 : vector<16x256xf32>, i32 -> vector<16x256xf32>
    %c255_i32 = arith.constant 255 : i32
    %8 = tpu.dynamic_rotate %1 by %c255_i32 dim 1 : vector<16x256xf32>, i32 -> vector<16x256xf32>
    %c241_i32 = arith.constant 241 : i32
    %9 = tpu.dynamic_rotate %1 by %c241_i32 dim 1 : vector<16x256xf32>, i32 -> vector<16x256xf32>
    %c240_i32 = arith.constant 240 : i32
    %10 = tpu.dynamic_rotate %1 by %c240_i32 dim 1 : vector<16x256xf32>, i32 -> vector<16x256xf32>
    %c239_i32 = arith.constant 239 : i32
    %11 = tpu.dynamic_rotate %1 by %c239_i32 dim 1 : vector<16x256xf32>, i32 -> vector<16x256xf32>
    %12 = tpu.concatenate %4, %5, %6, %7, %1, %8, %9, %10, %11 in 0 : vector<16x256xf32>, vector<16x256xf32>, vector<16x256xf32>, vector<16x256xf32>, vector<16x256xf32>, vector<16x256xf32>, vector<16x256xf32>, vector<16x256xf32>, vector<16x256xf32> -> vector<144x256xf32>
    %c0_6 = arith.constant 0 : index
    %c0_7 = arith.constant 0 : index
    %13 = vector.load %arg1[%c0_6, %c0_7] : memref<144x256xf32, #tpu.memory_space<vmem>>, vector<144x256xf32>
    %14 = arith.mulf %12, %13 : vector<144x256xf32>
    %15 = arith.truncf %14 : vector<144x256xf32> to vector<144x256xbf16>
    %cst = arith.constant dense<0.000000e+00> : vector<16x256xf32>
    %16 = tpu.matmul %2, %15, %cst {dimension_numbers = #tpu.dot_dimension_numbers<[1], [0], [0], [1], [0, 0, 1, 1], [], []>} : vector<16x144xbf16>, vector<144x256xbf16>, vector<16x256xf32> -> vector<16x256xf32>
    %17 = vector.broadcast %3 : vector<16x1xf32> to vector<16x256xf32>
    %18 = arith.addf %16, %17 : vector<16x256xf32>
    %cst_8 = arith.constant 0.000000e+00 : f32
    %19 = vector.broadcast %cst_8 : f32 to vector<16x256xf32>
    %20 = arith.maximumf %18, %19 : vector<16x256xf32>
    %c0_i32 = arith.constant 0 : i32
    %c4_i32 = arith.constant 4 : i32
    %21 = arith.addi %c0_i32, %c4_i32 : i32
    %c1_i32_9 = arith.constant 1 : i32
    %22 = scf.for %arg10 = %c0_i32 to %21 step %c1_i32_9 iter_args(%arg11 = %20) -> (vector<16x256xf32>)  : i32 {
      %42 = arith.index_cast %arg10 : i32 to index
      %c0_29 = arith.constant 0 : index
      %c0_30 = arith.constant 0 : index
      %43 = vector.load %arg5[%42, %c0_29, %c0_30] : memref<4x16x144xbf16, #tpu.memory_space<vmem>>, vector<1x16x144xbf16>
      %44 = vector.shape_cast %43 : vector<1x16x144xbf16> to vector<16x144xbf16>
      %45 = arith.index_cast %arg10 : i32 to index
      %c0_31 = arith.constant 0 : index
      %c0_32 = arith.constant 0 : index
      %46 = vector.load %arg6[%45, %c0_31, %c0_32] : memref<4x16x1xf32, #tpu.memory_space<vmem>>, vector<1x16x1xf32>
      %47 = vector.shape_cast %46 : vector<1x16x1xf32> to vector<16x1xf32>
      %c17_i32_33 = arith.constant 17 : i32
      %48 = tpu.dynamic_rotate %arg11 by %c17_i32_33 dim 1 : vector<16x256xf32>, i32 -> vector<16x256xf32>
      %c16_i32_34 = arith.constant 16 : i32
      %49 = tpu.dynamic_rotate %arg11 by %c16_i32_34 dim 1 : vector<16x256xf32>, i32 -> vector<16x256xf32>
      %c15_i32_35 = arith.constant 15 : i32
      %50 = tpu.dynamic_rotate %arg11 by %c15_i32_35 dim 1 : vector<16x256xf32>, i32 -> vector<16x256xf32>
      %c1_i32_36 = arith.constant 1 : i32
      %51 = tpu.dynamic_rotate %arg11 by %c1_i32_36 dim 1 : vector<16x256xf32>, i32 -> vector<16x256xf32>
      %c255_i32_37 = arith.constant 255 : i32
      %52 = tpu.dynamic_rotate %arg11 by %c255_i32_37 dim 1 : vector<16x256xf32>, i32 -> vector<16x256xf32>
      %c241_i32_38 = arith.constant 241 : i32
      %53 = tpu.dynamic_rotate %arg11 by %c241_i32_38 dim 1 : vector<16x256xf32>, i32 -> vector<16x256xf32>
      %c240_i32_39 = arith.constant 240 : i32
      %54 = tpu.dynamic_rotate %arg11 by %c240_i32_39 dim 1 : vector<16x256xf32>, i32 -> vector<16x256xf32>
      %c239_i32_40 = arith.constant 239 : i32
      %55 = tpu.dynamic_rotate %arg11 by %c239_i32_40 dim 1 : vector<16x256xf32>, i32 -> vector<16x256xf32>
      %56 = tpu.concatenate %48, %49, %50, %51, %arg11, %52, %53, %54, %55 in 0 : vector<16x256xf32>, vector<16x256xf32>, vector<16x256xf32>, vector<16x256xf32>, vector<16x256xf32>, vector<16x256xf32>, vector<16x256xf32>, vector<16x256xf32>, vector<16x256xf32> -> vector<144x256xf32>
      %c0_41 = arith.constant 0 : index
      %c0_42 = arith.constant 0 : index
      %57 = vector.load %arg1[%c0_41, %c0_42] : memref<144x256xf32, #tpu.memory_space<vmem>>, vector<144x256xf32>
      %58 = arith.mulf %56, %57 : vector<144x256xf32>
      %59 = arith.truncf %58 : vector<144x256xf32> to vector<144x256xbf16>
      %cst_43 = arith.constant dense<0.000000e+00> : vector<16x256xf32>
      %60 = tpu.matmul %44, %59, %cst_43 {dimension_numbers = #tpu.dot_dimension_numbers<[1], [0], [0], [1], [0, 0, 1, 1], [], []>} : vector<16x144xbf16>, vector<144x256xbf16>, vector<16x256xf32> -> vector<16x256xf32>
      %61 = vector.broadcast %47 : vector<16x1xf32> to vector<16x256xf32>
      %62 = arith.addf %60, %61 : vector<16x256xf32>
      %cst_44 = arith.constant 0.000000e+00 : f32
      %63 = vector.broadcast %cst_44 : f32 to vector<16x256xf32>
      %64 = arith.maximumf %62, %63 : vector<16x256xf32>
      scf.yield %64 : vector<16x256xf32>
    }
    %c4_i32_10 = arith.constant 4 : i32
    %c0_11 = arith.constant 0 : index
    %c0_12 = arith.constant 0 : index
    %23 = vector.load %arg7[%c0_11, %c0_12] : memref<8x144xbf16, #tpu.memory_space<vmem>>, vector<8x144xbf16>
    %c0_13 = arith.constant 0 : index
    %c0_14 = arith.constant 0 : index
    %24 = vector.load %arg8[%c0_13, %c0_14] : memref<8x1xf32, #tpu.memory_space<vmem>>, vector<8x1xf32>
    %c17_i32_15 = arith.constant 17 : i32
    %25 = tpu.dynamic_rotate %22 by %c17_i32_15 dim 1 : vector<16x256xf32>, i32 -> vector<16x256xf32>
    %c16_i32_16 = arith.constant 16 : i32
    %26 = tpu.dynamic_rotate %22 by %c16_i32_16 dim 1 : vector<16x256xf32>, i32 -> vector<16x256xf32>
    %c15_i32_17 = arith.constant 15 : i32
    %27 = tpu.dynamic_rotate %22 by %c15_i32_17 dim 1 : vector<16x256xf32>, i32 -> vector<16x256xf32>
    %c1_i32_18 = arith.constant 1 : i32
    %28 = tpu.dynamic_rotate %22 by %c1_i32_18 dim 1 : vector<16x256xf32>, i32 -> vector<16x256xf32>
    %c255_i32_19 = arith.constant 255 : i32
    %29 = tpu.dynamic_rotate %22 by %c255_i32_19 dim 1 : vector<16x256xf32>, i32 -> vector<16x256xf32>
    %c241_i32_20 = arith.constant 241 : i32
    %30 = tpu.dynamic_rotate %22 by %c241_i32_20 dim 1 : vector<16x256xf32>, i32 -> vector<16x256xf32>
    %c240_i32_21 = arith.constant 240 : i32
    %31 = tpu.dynamic_rotate %22 by %c240_i32_21 dim 1 : vector<16x256xf32>, i32 -> vector<16x256xf32>
    %c239_i32_22 = arith.constant 239 : i32
    %32 = tpu.dynamic_rotate %22 by %c239_i32_22 dim 1 : vector<16x256xf32>, i32 -> vector<16x256xf32>
    %33 = tpu.concatenate %25, %26, %27, %28, %22, %29, %30, %31, %32 in 0 : vector<16x256xf32>, vector<16x256xf32>, vector<16x256xf32>, vector<16x256xf32>, vector<16x256xf32>, vector<16x256xf32>, vector<16x256xf32>, vector<16x256xf32>, vector<16x256xf32> -> vector<144x256xf32>
    %c0_23 = arith.constant 0 : index
    %c0_24 = arith.constant 0 : index
    %34 = vector.load %arg1[%c0_23, %c0_24] : memref<144x256xf32, #tpu.memory_space<vmem>>, vector<144x256xf32>
    %35 = arith.mulf %33, %34 : vector<144x256xf32>
    %36 = arith.truncf %35 : vector<144x256xf32> to vector<144x256xbf16>
    %cst_25 = arith.constant dense<0.000000e+00> : vector<8x256xf32>
    %37 = tpu.matmul %23, %36, %cst_25 {dimension_numbers = #tpu.dot_dimension_numbers<[1], [0], [0], [1], [0, 0, 1, 1], [], []>} : vector<8x144xbf16>, vector<144x256xbf16>, vector<8x256xf32> -> vector<8x256xf32>
    %38 = vector.broadcast %24 : vector<8x1xf32> to vector<8x256xf32>
    %39 = arith.addf %37, %38 : vector<8x256xf32>
    %40 = vector.shape_cast %39 : vector<8x256xf32> to vector<1x8x256xf32>
    %c0_26 = arith.constant 0 : index
    %c0_27 = arith.constant 0 : index
    %c0_28 = arith.constant 0 : index
    %41 = vector.load %arg9[%c0_26, %c0_27, %c0_28] : memref<1x8x256xf32, #tpu.memory_space<vmem>>, vector<1x8x256xf32>
    tpu.vector_store %arg9[%c0_26, %c0_27, %c0_28], %40 {strides = array<i32>} : memref<1x8x256xf32, #tpu.memory_space<vmem>>, vector<1x8x256xf32>,
    return
  }
  func.func @transform_0(%arg0: i32) -> (i32, i32) {
    %c0_i32 = arith.constant 0 : i32
    %c0_i32_0 = arith.constant 0 : i32
    %c0_i32_1 = arith.constant 0 : i32
    return %c0_i32, %c0_i32_0 : i32, i32
  }
  func.func @transform_1(%arg0: i32) -> (i32, i32, i32) {
    %c0_i32 = arith.constant 0 : i32
    %c0_i32_0 = arith.constant 0 : i32
    %c0_i32_1 = arith.constant 0 : i32
    return %arg0, %c0_i32, %c0_i32_0 : i32, i32, i32
  }
  func.func @transform_2(%arg0: i32) -> (i32, i32) {
    %c0_i32 = arith.constant 0 : i32
    %c0_i32_0 = arith.constant 0 : i32
    %c0_i32_1 = arith.constant 0 : i32
    return %c0_i32, %c0_i32_0 : i32, i32
  }
  func.func @transform_3(%arg0: i32) -> (i32, i32) {
    %c0_i32 = arith.constant 0 : i32
    %c0_i32_0 = arith.constant 0 : i32
    %c0_i32_1 = arith.constant 0 : i32
    return %c0_i32, %c0_i32_0 : i32, i32
  }
  func.func @transform_4(%arg0: i32) -> (i32, i32, i32) {
    %c0_i32 = arith.constant 0 : i32
    %c0_i32_0 = arith.constant 0 : i32
    %c0_i32_1 = arith.constant 0 : i32
    %c0_i32_2 = arith.constant 0 : i32
    return %c0_i32, %c0_i32_0, %c0_i32_1 : i32, i32, i32
  }
  func.func @transform_5(%arg0: i32) -> (i32, i32, i32) {
    %c0_i32 = arith.constant 0 : i32
    %c0_i32_0 = arith.constant 0 : i32
    %c0_i32_1 = arith.constant 0 : i32
    %c0_i32_2 = arith.constant 0 : i32
    return %c0_i32, %c0_i32_0, %c0_i32_1 : i32, i32, i32
  }
  func.func @transform_6(%arg0: i32) -> (i32, i32) {
    %c0_i32 = arith.constant 0 : i32
    %c0_i32_0 = arith.constant 0 : i32
    %c0_i32_1 = arith.constant 0 : i32
    return %c0_i32, %c0_i32_0 : i32, i32
  }
  func.func @transform_7(%arg0: i32) -> (i32, i32) {
    %c0_i32 = arith.constant 0 : i32
    %c0_i32_0 = arith.constant 0 : i32
    %c0_i32_1 = arith.constant 0 : i32
    return %c0_i32, %c0_i32_0 : i32, i32
  }
  func.func @transform_8(%arg0: i32) -> (i32, i32, i32) {
    %c0_i32 = arith.constant 0 : i32
    %c0_i32_0 = arith.constant 0 : i32
    %c0_i32_1 = arith.constant 0 : i32
    return %arg0, %c0_i32, %c0_i32_0 : i32, i32, i32
  }
}

</mosaic_0001>

<bundles_post_ra>
// kernel: search_controller_forward.1
= control target key start
LH: loop header
LB: loop body
LE: loop exit
PB: predicated region body
PF: predicated region fallthrough
CT: control target
= control target key end

     0   :  { %s1403_s27 = smov 0   ;;  %s2265_s0 = inlined_call_operand.vmem [shape: f32[144,256], index: 0, kind: input, shape index: {}]   ;;  %s2266_s1 = inlined_call_operand.vmem [shape: f32[2,16,256], index: 1, kind: input, shape index: {}]   ;;  %s2267_s2 = inlined_call_operand.vmem [shape: bf16[16,144], index: 2, kind: input, shape index: {}]   ;;  %s2268_s3 = inlined_call_operand.vmem [shape: f32[16,1], index: 3, kind: input, shape index: {}]   ;;  %s2269_s4 = inlined_call_operand.vmem [shape: bf16[4,16,144], index: 4, kind: input, shape index: {}]   ;;  %s2270_s5 = inlined_call_operand.vmem [shape: f32[4,16,1], index: 5, kind: input, shape index: {}]   ;;  %s2271_s6 = inlined_call_operand.vmem [shape: bf16[8,144], index: 6, kind: input, shape index: {}]   ;;  %s2272_s7 = inlined_call_operand.vmem [shape: f32[8,1], index: 7, kind: input, shape index: {}]   ;;  %s2273_s8 = inlined_call_operand.vmem [shape: f32[2,8,256], index: 8, kind: output, shape index: {}]  }
   0x1 LB: > { %s1177_s28 = sadd.s32 4294967295, %s1318_s27   ;;  %p1181_p0 = scmp.ge.s32.totalorder %s1318_s27, 1  ;;  %s1318_s27 = sphi %s1403_s27, %s18_s27  }
   0x2   : > { %p262_p1 = scmp.lt.s32.totalorder %s1318_s27, 3 }
   0x4   : > { %p263_p2 = pnand %p1181_p0, %p262_p1 }
   0x6   : > { %266 = sbr.rel (%p263_p2) target bundleno = 1047 (0x417), region = 52 }
   0xb   : > { %p296_p3 = scmp.lt.s32.totalorder %s1177_s28, 1  ;;  %s1340_s15 = smov 112   ;;  %v323_v6 = vlaneseq  ;;  %v1497_v11 = vld [vmem:[%s2265_s0 + $0xe0] sm:$0xff]  ;;  %v1506_v14 = vld [vmem:[%s2265_s0 + $0xf0] sm:$0xff]  ;;  %v1511_v15 = vld [vmem:[%s2265_s0 + $0xe8] sm:$0xff]  ;;  %vm530_vm8 = vcmask 130048  }
   0xc   : > { %s1341_s16 = smov 113   ;;  %s1342_s17 = smov 127   ;;  %v1516_v16 = vld [vmem:[%s2265_s0 + $0xf8] sm:$0xff]  ;;  %v1530_v28 = vld [vmem:[%s2265_s0 + $0xd0] sm:$0xff]  ;;  %v1540_v30 = vld [vmem:[%s2265_s0 + $0xc0] sm:$0xff] }
   0xd   : > { %s2287_s28 = smov (!%p296_p3, %s1177_s28), 1  ;;  %s1343_s18 = smov 1   ;;  %v1491_v8 = vand.u32 127, %v323_v6  ;;  %v1535_v29 = vld [vmem:[%s2265_s0 + $0xd8] sm:$0xff]  ;;  %v1545_v31 = vld [vmem:[%s2265_s0 + $0xc8] sm:$0xff]  ;;  %v1562_v44 = vld [vmem:[%s2265_s0 + $0x80] sm:$0xff] }
   0xe   : > { %s1213_s29 = sshll.u32 %s2287_s28, 5  ;;  %s1214_s30 = sshll.u32 %s2287_s28, 4  ;;  %v1567_v45 = vld [vmem:[%s2265_s0 + $0x90] sm:$0xff]  ;;  %v1572_v46 = vld [vmem:[%s2265_s0 + $0x88] sm:$0xff]  ;;  %v1577_v47 = vld [vmem:[%s2265_s0 + $0x98] sm:$0xff] }
   0xf   : > { %s300_s11 = scalar_lea.vmem %s2266_s1, %s1213_s29  ;;  %s1417_s14 = scalar_lea.vmem %s2273_s8, %s1214_s30  ;;  %vm403_vm0 = vcmp.lt.s32.totalorder %v1491_v8, 112  ;;  %vm390_vm1 = vcmp.lt.s32.totalorder %v1491_v8, 113  ;;  %vm377_vm2 = vcmp.lt.s32.totalorder %v1491_v8, 127  ;;  %v1583_v48 = vld [vmem:[%s2265_s0 + $0xa0] sm:$0xff]  ;;  %v1588_v49 = vld [vmem:[%s2265_s0 + $0xa8] sm:$0xff]  ;;  %v1593_v50 = vld [vmem:[%s2265_s0 + $0xb0] sm:$0xff] }
  0x10   : > { %v1419_v0 = vld [vmem:[%s300_s11 + $0x8] sm:$0xff]  ;;  %v1421_v1 = vld [vmem:[%s300_s11] sm:$0xff]  ;;  %v1429_v2 = vld [vmem:[%s300_s11 + $0x18] sm:$0xff]  ;;  %s1344_s19 = smov 15   ;;  %s1345_s20 = smov 16   ;;  %vm364_vm3 = vcmp.lt.s32.totalorder %v1491_v8, 1 }
  0x11   : > { %399 = vrot.lane.b32.xlu1 %v1419_v0, %s1340_s15  ;;  %395 = vrot.lane.b32.xlu0 %v1421_v1, %s1340_s15  ;;  %v1431_v3 = vld [vmem:[%s300_s11 + $0x10] sm:$0xff]  ;;  %s1346_s21 = smov 17   ;;  %s1347_s22 = smov 111   ;;  %v1598_v51 = vld [vmem:[%s2265_s0 + $0xb8] sm:$0xff]  ;;  %v473_v55 = vmul.f32 %v1562_v44, %v1421_v1  ;;  %v474_v57 = vmul.f32 %v1572_v46, %v1419_v0  ;;  %v476_v58 = vmul.f32 %v1577_v47, %v1429_v2  ;;  %vm351_vm4 = vcmp.lt.s32.totalorder %v1491_v8, 15 }
  0x12   : > { %382 = vrot.lane.b32.xlu2 %v1421_v1, %s1341_s16  ;;  %v475_v56 = vmul.f32 %v1567_v45, %v1431_v3  ;;  %vm338_vm5 = vcmp.lt.s32.totalorder %v1491_v8, 16  ;;  %vm325_vm6 = vcmp.lt.s32.totalorder %v1491_v8, 17  ;;  %vm416_vm7 = vcmp.lt.s32.totalorder %v1491_v8, 111  ;;  %s1815_s23 = smov 0  }
  0x13   : > { %v502_v6 = vpack.c.bf16 %v476_v58, %v474_v57 }
  0x19   : > { %401 = vrot.lane.b32.xlu1 %v1429_v2, %s1340_s15  ;;  %397 = vrot.lane.b32.xlu0 %v1431_v3, %s1340_s15 }
  0x1a   : > { %384 = vrot.lane.b32.xlu2 %v1431_v3, %s1341_s16 }
  0x21   : > { %388 = vrot.lane.b32.xlu1 %v1429_v2, %s1341_s16  ;;  %386 = vrot.lane.b32.xlu0 %v1419_v0, %s1341_s16 }
  0x22   : > { %369 = vrot.lane.b32.xlu2 %v1421_v1, %s1342_s17 }
  0x29   : > { %373 = vrot.lane.b32.xlu1 %v1419_v0, %s1342_s17  ;;  %371 = vrot.lane.b32.xlu0 %v1431_v3, %s1342_s17 }
  0x2a   : > { %375 = vrot.lane.b32.xlu2 %v1429_v2, %s1342_s17 }
  0x31   : > { %358 = vrot.lane.b32.xlu1 %v1431_v3, %s1343_s18  ;;  %356 = vrot.lane.b32.xlu0 %v1421_v1, %s1343_s18 }
  0x32   : > { %360 = vrot.lane.b32.xlu2 %v1419_v0, %s1343_s18 }
  0x39   : > { %343 = vrot.lane.b32.xlu1 %v1421_v1, %s1344_s19  ;;  %362 = vrot.lane.b32.xlu0 %v1429_v2, %s1343_s18 }
  0x3a   : > { %345 = vrot.lane.b32.xlu2 %v1431_v3, %s1344_s19 }
  0x41   : > { %349 = vrot.lane.b32.xlu1 %v1429_v2, %s1344_s19  ;;  %347 = vrot.lane.b32.xlu0 %v1419_v0, %s1344_s19 }
  0x42   : > { %330 = vrot.lane.b32.xlu2 %v1421_v1, %s1345_s20 }
  0x49   : > { %334 = vrot.lane.b32.xlu1 %v1419_v0, %s1345_s20  ;;  %332 = vrot.lane.b32.xlu0 %v1431_v3, %s1345_s20 }
  0x4a   : > { %336 = vrot.lane.b32.xlu2 %v1429_v2, %s1345_s20 }
  0x51   : > { %317 = vrot.lane.b32.xlu1 %v1431_v3, %s1346_s21  ;;  %315 = vrot.lane.b32.xlu0 %v1421_v1, %s1346_s21 }
  0x52   : > { %319 = vrot.lane.b32.xlu2 %v1419_v0, %s1346_s21 }
  0x59   : > { %408 = vrot.lane.b32.xlu1 %v1421_v1, %s1347_s22  ;;  %321 = vrot.lane.b32.xlu0 %v1429_v2, %s1346_s21 }
  0x5a   : > { %410 = vrot.lane.b32.xlu2 %v1431_v3, %s1347_s22 }
  0x61   : > { %414 = vrot.lane.b32.xlu1 %v1429_v2, %s1347_s22  ;;  %412 = vrot.lane.b32.xlu0 %v1419_v0, %s1347_s22 }
  0x6c   : > { %v383_v4 = vpop.permute.xlu2 %382 }
  0x74   : > { %v385_v5 = vpop.permute.xlu2 %384 }
  0x7c   : > { %v370_v10 = vpop.permute.xlu2 %369 }
  0x83   : > { %v400_v7 = vpop.permute.xlu1 %399  ;;  %v396_v9 = vpop.permute.xlu0 %395 }
  0x84   : > { %v404_v12 = vsel %vm403_vm0, %v396_v9, %v400_v7  ;;  %v406_v13 = vsel %vm403_vm0, %v400_v7, %v396_v9  ;;  %v376_v27 = vpop.permute.xlu2 %375 }
  0x85   : > { %v485_v21 = vmul.f32 %v1497_v11, %v404_v12  ;;  %v486_v23 = vmul.f32 %v1511_v15, %v406_v13  ;;  %v1624_v12 = vld [vmem:[%s2265_s0 + $0x60] sm:$0xff]  ;;  %v1629_v13 = vld [vmem:[%s2265_s0 + $0x68] sm:$0xff] }
  0x8b   : > { %v402_v17 = vpop.permute.xlu1 %401  ;;  %v398_v18 = vpop.permute.xlu0 %397 }
  0x8c   : > { %v405_v19 = vsel %vm403_vm0, %v398_v18, %v402_v17  ;;  %v407_v20 = vsel %vm403_vm0, %v402_v17, %v398_v18  ;;  %v361_v52 = vpop.permute.xlu2 %360 }
  0x8d   : > { %v487_v22 = vmul.f32 %v1506_v14, %v405_v19  ;;  %v488_v24 = vmul.f32 %v1516_v16, %v407_v20  ;;  %v1638_v19 = vld [vmem:[%s2265_s0 + $0x70] sm:$0xff]  ;;  %v1643_v20 = vld [vmem:[%s2265_s0 + $0x78] sm:$0xff] }
  0x8f   : > { %v507_v25 = vpack.c.bf16 %v487_v22, %v485_v21  ;;  %v508_v26 = vpack.c.bf16 %v488_v24, %v486_v23 }
  0x91   : > { %534 = vmatpush.bf16.msra.mxu0 %v507_v25  ;;  %562 = vmatpush.bf16.msra.mxu2 %v508_v26 }
  0x93   : > { %v389_v32 = vpop.permute.xlu1 %388  ;;  %v387_v33 = vpop.permute.xlu0 %386 }
  0x94   : > { %v392_v34 = vsel %vm390_vm1, %v385_v5, %v389_v32  ;;  %v394_v35 = vsel %vm390_vm1, %v389_v32, %v385_v5  ;;  %v391_v36 = vsel %vm390_vm1, %v383_v4, %v387_v33  ;;  %v393_v37 = vsel %vm390_vm1, %v387_v33, %v383_v4 }
  0x95   : > { %v483_v38 = vmul.f32 %v1530_v28, %v392_v34  ;;  %v484_v39 = vmul.f32 %v1535_v29, %v394_v35  ;;  %v481_v40 = vmul.f32 %v1540_v30, %v391_v36  ;;  %v482_v41 = vmul.f32 %v1545_v31, %v393_v37  ;;  %v1657_v36 = vld [vmem:[%s2265_s0 + $0x50] sm:$0xff]  ;;  %v1662_v37 = vld [vmem:[%s2265_s0 + $0x58] sm:$0xff] }
  0x96   : > { %v501_v5 = vpack.c.bf16 %v475_v56, %v473_v55 }
  0x97   : > { %v505_v42 = vpack.c.bf16 %v483_v38, %v481_v40  ;;  %v506_v43 = vpack.c.bf16 %v484_v39, %v482_v41  ;;  %v1667_v38 = vld [vmem:[%s2265_s0 + $0x40] sm:$0xff]  ;;  %v1672_v39 = vld [vmem:[%s2265_s0 + $0x48] sm:$0xff] }
  0x99   : > { %535 = vmatpush.bf16.msra.mxu0 %v505_v42  ;;  %563 = vmatpush.bf16.msra.mxu2 %v506_v43 }
  0x9b   : > { %v374_v53 = vpop.permute.xlu1 %373  ;;  %v372_v54 = vpop.permute.xlu0 %371 }
  0x9c   : > { %v378_v59 = vsel %vm377_vm2, %v370_v10, %v374_v53  ;;  %v380_v60 = vsel %vm377_vm2, %v374_v53, %v370_v10  ;;  %v379_v61 = vsel %vm377_vm2, %v372_v54, %v376_v27  ;;  %v381_v62 = vsel %vm377_vm2, %v376_v27, %v372_v54  ;;  %v346_v10 = vpop.permute.xlu2 %345 }
  0x9d   : > { %v477_v63 = vmul.f32 %v1583_v48, %v378_v59  ;;  %v478_v1 = vmul.f32 %v1588_v49, %v380_v60  ;;  %v479_v0 = vmul.f32 %v1593_v50, %v379_v61  ;;  %v480_v2 = vmul.f32 %v1598_v51, %v381_v62  ;;  %v1690_v60 = vld [vmem:[%s2265_s0 + $0x20] sm:$0xff]  ;;  %v1695_v62 = vld [vmem:[%s2265_s0 + $0x28] sm:$0xff] }
  0x9f   : > { %v503_v3 = vpack.c.bf16 %v479_v0, %v477_v63  ;;  %v504_v4 = vpack.c.bf16 %v480_v2, %v478_v1  ;;  %v1700_v63 = vld [vmem:[%s2265_s0 + $0x30] sm:$0xff]  ;;  %v1705_v1 = vld [vmem:[%s2265_s0 + $0x38] sm:$0xff] }
  0xa1   : > { %536 = vmatpush.bf16.msra.mxu0 %v503_v3  ;;  %564 = vmatpush.bf16.msra.mxu2 %v504_v4 }
  0xa3   : > { %v359_v7 = vpop.permute.xlu1 %358  ;;  %v357_v9 = vpop.permute.xlu0 %356 }
  0xa4   : > { %v365_v17 = vsel %vm364_vm3, %v357_v9, %v361_v52  ;;  %v367_v18 = vsel %vm364_vm3, %v361_v52, %v357_v9  ;;  %v331_v35 = vpop.permute.xlu2 %330 }
  0xa5   : > { %537 = vmatpush.bf16.msra.mxu0 %v501_v5  ;;  %565 = vmatpush.bf16.msra.mxu2 %v502_v6  ;;  %v469_v25 = vmul.f32 %v1624_v12, %v367_v18  ;;  %v470_v26 = vmul.f32 %v1629_v13, %v365_v17  ;;  %v314_v18 = vld [vmem:[%s2268_s3 + $0x8] sm:$0xff] }
  0xab   : > { %v344_v21 = vpop.permute.xlu1 %343  ;;  %v363_v22 = vpop.permute.xlu0 %362 }
  0xac   : > { %v366_v23 = vsel %vm364_vm3, %v359_v7, %v363_v22  ;;  %v368_v24 = vsel %vm364_vm3, %v363_v22, %v359_v7  ;;  %v337_v61 = vpop.permute.xlu2 %336 }
  0xad   : > { %v471_v27 = vmul.f32 %v1638_v19, %v368_v24  ;;  %v472_v32 = vmul.f32 %v1643_v20, %v366_v23  ;;  %v2274_v24 = vmov 0  }
  0xae   : > { %1287 = vset.pattern.permute.xlu0 %v2274_v24  ;;  %1286 = vset.pattern.permute.xlu2 %v2274_v24 }
  0xaf   : > { %v499_v33 = vpack.c.bf16 %v471_v27, %v469_v25  ;;  %v500_v34 = vpack.c.bf16 %v472_v32, %v470_v26  ;;  %518 = vperm.xlu0 %1287, %v314_v18   ;;  %v1731_v32 = vld [vmem:[%s2265_s0] sm:$0xff] }
  0xb1   : > { %538 = vmatpush.bf16.msra.mxu0 %v499_v33  ;;  %566 = vmatpush.bf16.msra.mxu2 %v500_v34  ;;  %v1736_v33 = vld [vmem:[%s2265_s0 + $0x8] sm:$0xff] }
  0xb3   : > { %v350_v40 = vpop.permute.xlu1 %349  ;;  %v348_v41 = vpop.permute.xlu0 %347 }
  0xb4   : > { %v353_v42 = vsel %vm351_vm4, %v346_v10, %v350_v40  ;;  %v355_v43 = vsel %vm351_vm4, %v350_v40, %v346_v10  ;;  %v352_v52 = vsel %vm351_vm4, %v344_v21, %v348_v41  ;;  %v354_v53 = vsel %vm351_vm4, %v348_v41, %v344_v21  ;;  %v313_v21 = vld [vmem:[%s2268_s3] sm:$0xff]  ;;  %v320_v27 = vpop.permute.xlu2 %319  ;;  %v1745_v40 = vld [vmem:[%s2265_s0 + $0x10] sm:$0xff]  ;;  %v1750_v41 = vld [vmem:[%s2265_s0 + $0x18] sm:$0xff] }
  0xb5   : > { %v467_v54 = vmul.f32 %v1657_v36, %v355_v43  ;;  %v468_v55 = vmul.f32 %v1662_v37, %v353_v42  ;;  %v465_v56 = vmul.f32 %v1667_v38, %v354_v53  ;;  %v466_v57 = vmul.f32 %v1672_v39, %v352_v52  ;;  %513 = vperm.xlu2 %1286, %v313_v21  }
  0xb7   : > { %v497_v58 = vpack.c.bf16 %v467_v54, %v465_v56  ;;  %v498_v59 = vpack.c.bf16 %v468_v55, %v466_v57 }
  0xb9   : > { %539 = vmatpush.bf16.msra.mxu0 %v497_v58  ;;  %567 = vmatpush.bf16.msra.mxu2 %v498_v59  ;;  %v1188_v58 = vld [vmem:[%s2267_s2] sm:$0xf]  ;;  %v1216_v59 = vld [vmem:[%s2267_s2 + $0x4] sm:$0xf0] }
  0xbb   : > { %v335_v0 = vpop.permute.xlu1 %334  ;;  %v333_v2 = vpop.permute.xlu0 %332 }
  0xbc   : > { %v339_v3 = vsel %vm338_vm5, %v331_v35, %v335_v0  ;;  %v341_v4 = vsel %vm338_vm5, %v335_v0, %v331_v35  ;;  %v340_v5 = vsel %vm338_vm5, %v333_v2, %v337_v61  ;;  %v342_v6 = vsel %vm338_vm5, %v337_v61, %v333_v2 }
  0xbd   : > { %v461_v7 = vmul.f32 %v1690_v60, %v341_v4  ;;  %v462_v9 = vmul.f32 %v1695_v62, %v339_v3  ;;  %v463_v10 = vmul.f32 %v1700_v63, %v342_v6  ;;  %v464_v17 = vmul.f32 %v1705_v1, %v340_v5  ;;  %v411_v3 = vpop.permute.xlu2 %410  ;;  %v1770_v4 = vld [vmem:[%s2265_s0 + $0x100] sm:$0xff]  ;;  %v1775_v5 = vld [vmem:[%s2265_s0 + $0x110] sm:$0xff]  ;;  %v1780_v6 = vld [vmem:[%s2265_s0 + $0x108] sm:$0xff] }
  0xbe   : > { %v1189_v2 = vor.u32 %v1216_v59, %v1188_v58  ;;  %2277 = vst [vmem:[#allocation2_spill] sm:$0xff] %v1780_v6 }
  0xbf   : > { %v495_v22 = vpack.c.bf16 %v463_v10, %v461_v7  ;;  %v496_v23 = vpack.c.bf16 %v464_v17, %v462_v9  ;;  %v1785_v7 = vld [vmem:[%s2265_s0 + $0x118] sm:$0xff] }
  0xc1   : > { %540 = vmatpush.bf16.msra.mxu0 %v495_v22  ;;  %568 = vmatpush.bf16.msra.mxu2 %v496_v23 }
  0xc3   : > { %v318_v25 = vpop.permute.xlu1 %317  ;;  %v316_v26 = vpop.permute.xlu0 %315 }
  0xc4   : > { %v326_v34 = vsel %vm325_vm6, %v316_v26, %v320_v27  ;;  %v328_v35 = vsel %vm325_vm6, %v320_v27, %v316_v26 }
  0xc5   : > { %v457_v54 = vmul.f32 %v1731_v32, %v328_v35  ;;  %v458_v55 = vmul.f32 %v1736_v33, %v326_v34  ;;  %v1215_v34 = vld [vmem:[%s2267_s2 + $0x4] sm:$0xf]  ;;  %v1190_v35 = vld [vmem:[%s2267_s2 + $0x8] sm:$0xf0] }
  0xcb   : > { %v409_v42 = vpop.permute.xlu1 %408  ;;  %v322_v43 = vpop.permute.xlu0 %321 }
  0xcc   : > { %v327_v52 = vsel %vm325_vm6, %v318_v25, %v322_v43  ;;  %v329_v53 = vsel %vm325_vm6, %v322_v43, %v318_v25 }
  0xcd   : > { %v459_v56 = vmul.f32 %v1745_v40, %v329_v53  ;;  %v460_v57 = vmul.f32 %v1750_v41, %v327_v52  ;;  %v1193_v52 = vor.u32 %v1215_v34, %v1190_v35 }
  0xcf   : > { %v493_v61 = vpack.c.bf16 %v459_v56, %v457_v54  ;;  %v494_v0 = vpack.c.bf16 %v460_v57, %v458_v55 }
  0xd1   : > { %541 = vmatpush.bf16.msra.mxu0 %v493_v61  ;;  %569 = vmatpush.bf16.msra.mxu2 %v494_v0 }
  0xd3   : > { %v415_v9 = vpop.permute.xlu1 %414  ;;  %v413_v10 = vpop.permute.xlu0 %412 }
  0xd4   : > { %v418_v17 = vsel %vm416_vm7, %v411_v3, %v415_v9  ;;  %v420_v18 = vsel %vm416_vm7, %v415_v9, %v411_v3  ;;  %v417_v21 = vsel %vm416_vm7, %v409_v42, %v413_v10  ;;  %v419_v22 = vsel %vm416_vm7, %v413_v10, %v409_v42  ;;  %570 = vmatmul.bf16.vlgmr.msra.gmra.mxu2 %v1189_v2 }
  0xd5   : > { %542 = vmatmul.bf16.vlgmr.msra.gmra.mxu0 %v1189_v2  ;;  %v489_v23 = vmul.f32 %v1770_v4, %v417_v21  ;;  %v491_v25 = vmul.f32 %v1775_v5, %v418_v17  ;;  %v490_v26 = vmul.f32 %v1780_v6, %v419_v22  ;;  %v492_v27 = vmul.f32 %v1785_v7, %v420_v18 }
  0xd7   : > { %v509_v43 = vpack.c.bf16 %v491_v25, %v489_v23  ;;  %v510_v42 = vpack.c.bf16 %v492_v27, %v490_v26 }
  0xd9   : > { %555 = vmatpush.bf16.msra.mxu1 %v509_v43  ;;  %583 = vmatpush.bf16.msra.mxu3 %v510_v42 }
  0xdc   : > { %1194 = vmatmul.msk.bf16.vlgmr.msra.gmra.mxu1 %vm530_vm8, %v1193_v52  ;;  %1195 = vmatmul.msk.bf16.vlgmr.msra.gmra.mxu3 %vm530_vm8, %v1193_v52 }
 0x10f   : > { %v514_v54 = vpop.permute.xlu2 %513 }
 0x121   : > { %v519_v0 = vpop.permute.xlu0 %518 }
 0x152   : > { %v543_v53 = vpop.f32.mrf.mxu0 }
 0x153   : > { %v544_v55 = vadd.f32 %v543_v53, %v514_v54 }
 0x157   : > { %v571_v56 = vpop.f32.mrf.mxu2 }
 0x158   : > { %v572_v59 = vadd.f32 %v571_v56, %v514_v54 }
 0x159   : > { %v557_v57 = vpop.f32.mrf.mxu1 }
 0x15a   : > { %v558_v58 = vadd.f32 %v557_v57, %v544_v55  ;;  %v545_v2 = vpop.f32.mrf.mxu0 }
 0x15b   : > { %v546_v9 = vadd.f32 %v545_v2, %v519_v0 }
 0x15c   : > { %v590_v61 = vmax.f32 %v558_v58, 0.0  }
 0x15f   : > { %v585_v3 = vpop.f32.mrf.mxu3  ;;  %v573_v22 = vpop.f32.mrf.mxu2 }
 0x160   : > { %v586_v10 = vadd.f32 %v585_v3, %v572_v59  ;;  %v574_v25 = vadd.f32 %v573_v22, %v519_v0 }
 0x161   : > { %v559_v17 = vpop.f32.mrf.mxu1 }
 0x162   : > { %v591_v18 = vmax.f32 %v586_v10, 0.0   ;;  %v560_v21 = vadd.f32 %v559_v17, %v546_v9 }
 0x164   : > { %v592_v23 = vmax.f32 %v560_v21, 0.0  }
 0x167   : > { %v587_v26 = vpop.f32.mrf.mxu3 }
 0x168   : > { %v588_v27 = vadd.f32 %v587_v26, %v574_v25 }
 0x16a   : > { %v593_v34 = vmax.f32 %v588_v27, 0.0  }
 0x16b LB: >> { %s1349_s24 = smov 112   ;;  %s1350_s25 = smov 113   ;;  %v737_v54 = vld [vmem:[%s2265_s0 + $0xe0] sm:$0xff]  ;;  %v739_v57 = vld [vmem:[%s2265_s0 + $0xf0] sm:$0xff]  ;;  %v738_v58 = vld [vmem:[%s2265_s0 + $0xe8] sm:$0xff]  ;;  %s1338_s23 = sphi %s1815_s23, %s599_s23   ;;  %v1334_v61 = vphi %v590_v61, %v2283_v61   ;;  %v1330_v18 = vphi %v591_v18, %v2282_v18   ;;  %v1326_v23 = vphi %v592_v23, %v2281_v23   ;;  %v1322_v34 = vphi %v593_v34, %v2280_v34  }
 0x16c   : >> { %685 = vrot.lane.b32.xlu0 %v1334_v61, %s1349_s24  ;;  %689 = vrot.lane.b32.xlu1 %v1330_v18, %s1349_s24  ;;  %s1351_s26 = smov 127   ;;  %s1352_s28 = smov 1   ;;  %v740_v59 = vld [vmem:[%s2265_s0 + $0xf8] sm:$0xff] }
 0x16d   : >> { %673 = vrot.lane.b32.xlu2 %v1334_v61, %s1350_s25  ;;  %s1353_s29 = smov 15   ;;  %s1354_s30 = smov 16  }
 0x16e   : >> { %s1355_s9 = smov 17   ;;  %s1356_s10 = smov 111  }
 0x174   : >> { %687 = vrot.lane.b32.xlu0 %v1326_v23, %s1349_s24  ;;  %691 = vrot.lane.b32.xlu1 %v1322_v34, %s1349_s24 }
 0x175   : >> { %675 = vrot.lane.b32.xlu2 %v1326_v23, %s1350_s25 }
 0x17c   : >> { %677 = vrot.lane.b32.xlu0 %v1330_v18, %s1350_s25  ;;  %679 = vrot.lane.b32.xlu1 %v1322_v34, %s1350_s25 }
 0x17d   : >> { %661 = vrot.lane.b32.xlu2 %v1334_v61, %s1351_s26 }
 0x184   : >> { %663 = vrot.lane.b32.xlu0 %v1326_v23, %s1351_s26  ;;  %665 = vrot.lane.b32.xlu1 %v1330_v18, %s1351_s26 }
 0x185   : >> { %667 = vrot.lane.b32.xlu2 %v1322_v34, %s1351_s26 }
 0x18c   : >> { %649 = vrot.lane.b32.xlu0 %v1334_v61, %s1352_s28  ;;  %651 = vrot.lane.b32.xlu1 %v1326_v23, %s1352_s28 }
 0x18d   : >> { %653 = vrot.lane.b32.xlu2 %v1330_v18, %s1352_s28 }
 0x194   : >> { %655 = vrot.lane.b32.xlu0 %v1322_v34, %s1352_s28  ;;  %637 = vrot.lane.b32.xlu1 %v1334_v61, %s1353_s29  ;;  %s1217_s28 = sshll.u32 %s1338_s23, 4  ;;  %s599_s23 = sadd.s32 1, %s1338_s23  }
 0x195   : >> { %639 = vrot.lane.b32.xlu2 %v1326_v23, %s1353_s29  ;;  %s610_s25 = scalar_lea.vmem %s2270_s5, %s1217_s28  ;;  %s2027_s26 = scalar_lea.vmem %s2269_s4, %s1217_s28 }
 0x196   : >> { %p596_p4 = scmp.ge.s32.totalorder %s599_s23, 4  }
 0x19c   : >> { %641 = vrot.lane.b32.xlu0 %v1330_v18, %s1353_s29  ;;  %643 = vrot.lane.b32.xlu1 %v1322_v34, %s1353_s29 }
 0x19d   : >> { %625 = vrot.lane.b32.xlu2 %v1334_v61, %s1354_s30 }
 0x1a4   : >> { %627 = vrot.lane.b32.xlu0 %v1326_v23, %s1354_s30  ;;  %629 = vrot.lane.b32.xlu1 %v1330_v18, %s1354_s30 }
 0x1a5   : >> { %631 = vrot.lane.b32.xlu2 %v1322_v34, %s1354_s30 }
 0x1ac   : >> { %613 = vrot.lane.b32.xlu0 %v1334_v61, %s1355_s9  ;;  %615 = vrot.lane.b32.xlu1 %v1326_v23, %s1355_s9 }
 0x1ad   : >> { %617 = vrot.lane.b32.xlu2 %v1330_v18, %s1355_s9 }
 0x1b4   : >> { %619 = vrot.lane.b32.xlu0 %v1322_v34, %s1355_s9  ;;  %697 = vrot.lane.b32.xlu1 %v1334_v61, %s1356_s10 }
 0x1b5   : >> { %699 = vrot.lane.b32.xlu2 %v1326_v23, %s1356_s10 }
 0x1bc   : >> { %701 = vrot.lane.b32.xlu0 %v1330_v18, %s1356_s10  ;;  %703 = vrot.lane.b32.xlu1 %v1322_v34, %s1356_s10 }
 0x1c7   : >> { %v674_v35 = vpop.permute.xlu2 %673 }
 0x1cf   : >> { %v676_v43 = vpop.permute.xlu2 %675 }
 0x1d7   : >> { %v662_v53 = vpop.permute.xlu2 %661 }
 0x1de   : >> { %v686_v42 = vpop.permute.xlu0 %685  ;;  %v690_v52 = vpop.permute.xlu1 %689 }
 0x1df   : >> { %v693_v55 = vsel %vm403_vm0, %v686_v42, %v690_v52  ;;  %v695_v56 = vsel %vm403_vm0, %v690_v52, %v686_v42  ;;  %v668_v27 = vpop.permute.xlu2 %667  ;;  %v733_v42 = vld [vmem:[%s2265_s0 + $0xc0] sm:$0xff]  ;;  %v734_v52 = vld [vmem:[%s2265_s0 + $0xc8] sm:$0xff] }
 0x1e0   : >> { %v773_v10 = vmul.f32 %v737_v54, %v693_v55  ;;  %v774_v21 = vmul.f32 %v738_v58, %v695_v56  ;;  %v735_v54 = vld [vmem:[%s2265_s0 + $0xd0] sm:$0xff]  ;;  %v736_v55 = vld [vmem:[%s2265_s0 + $0xd8] sm:$0xff] }
 0x1e6   : >> { %v688_v0 = vpop.permute.xlu0 %687  ;;  %v692_v2 = vpop.permute.xlu1 %691 }
 0x1e7   : >> { %v694_v3 = vsel %vm403_vm0, %v688_v0, %v692_v2  ;;  %v696_v9 = vsel %vm403_vm0, %v692_v2, %v688_v0 }
 0x1e8   : >> { %v775_v17 = vmul.f32 %v739_v57, %v694_v3  ;;  %v776_v22 = vmul.f32 %v740_v59, %v696_v9 }
 0x1ea   : >> { %v795_v25 = vpack.c.bf16 %v775_v17, %v773_v10  ;;  %v796_v26 = vpack.c.bf16 %v776_v22, %v774_v21 }
 0x1ec   : >> { %821 = vmatpush.bf16.msra.mxu0 %v795_v25  ;;  %849 = vmatpush.bf16.msra.mxu2 %v796_v26  ;;  %v725_v25 = vld [vmem:[%s2265_s0 + $0x80] sm:$0xff]  ;;  %v726_v26 = vld [vmem:[%s2265_s0 + $0x88] sm:$0xff] }
 0x1ee   : >> { %v678_v56 = vpop.permute.xlu0 %677  ;;  %v680_v57 = vpop.permute.xlu1 %679 }
 0x1ef   : >> { %v681_v58 = vsel %vm390_vm1, %v674_v35, %v678_v56  ;;  %v683_v59 = vsel %vm390_vm1, %v678_v56, %v674_v35  ;;  %v682_v0 = vsel %vm390_vm1, %v676_v43, %v680_v57  ;;  %v684_v2 = vsel %vm390_vm1, %v680_v57, %v676_v43  ;;  %v727_v35 = vld [vmem:[%s2265_s0 + $0x90] sm:$0xff]  ;;  %v728_v43 = vld [vmem:[%s2265_s0 + $0x98] sm:$0xff]  ;;  %v654_v56 = vpop.permute.xlu2 %653 }
 0x1f0   : >> { %v769_v3 = vmul.f32 %v733_v42, %v681_v58  ;;  %v770_v9 = vmul.f32 %v734_v52, %v683_v59  ;;  %v771_v10 = vmul.f32 %v735_v54, %v682_v0  ;;  %v772_v17 = vmul.f32 %v736_v55, %v684_v2  ;;  %v731_v42 = vld [vmem:[%s2265_s0 + $0xb0] sm:$0xff]  ;;  %v732_v52 = vld [vmem:[%s2265_s0 + $0xb8] sm:$0xff]  ;;  %v729_v54 = vld [vmem:[%s2265_s0 + $0xa0] sm:$0xff] }
 0x1f1   : >> { %v730_v55 = vld [vmem:[%s2265_s0 + $0xa8] sm:$0xff]  ;;  %v761_v59 = vmul.f32 %v1334_v61, %v725_v25  ;;  %v763_v0 = vmul.f32 %v1326_v23, %v727_v35  ;;  %v762_v2 = vmul.f32 %v1330_v18, %v726_v26 }
 0x1f2   : >> { %v793_v21 = vpack.c.bf16 %v771_v10, %v769_v3  ;;  %v794_v22 = vpack.c.bf16 %v772_v17, %v770_v9  ;;  %v764_v3 = vmul.f32 %v1322_v34, %v728_v43 }
 0x1f3   : >> { %v789_v34 = vpack.c.bf16 %v763_v0, %v761_v59 }
 0x1f4   : >> { %822 = vmatpush.bf16.msra.mxu0 %v793_v21  ;;  %850 = vmatpush.bf16.msra.mxu2 %v794_v22  ;;  %v790_v26 = vpack.c.bf16 %v764_v3, %v762_v2 }
 0x1f6   : >> { %v664_v57 = vpop.permute.xlu0 %663  ;;  %v666_v58 = vpop.permute.xlu1 %665 }
 0x1f7   : >> { %v670_v9 = vsel %vm377_vm2, %v664_v57, %v668_v27  ;;  %v672_v10 = vsel %vm377_vm2, %v668_v27, %v664_v57  ;;  %v669_v17 = vsel %vm377_vm2, %v662_v53, %v666_v58  ;;  %v671_v21 = vsel %vm377_vm2, %v666_v58, %v662_v53  ;;  %v640_v6 = vpop.permute.xlu2 %639  ;;  %v721_v27 = vld [vmem:[%s2265_s0 + $0x60] sm:$0xff]  ;;  %v722_v53 = vld [vmem:[%s2265_s0 + $0x68] sm:$0xff] }
 0x1f8   : >> { %v767_v22 = vmul.f32 %v731_v42, %v670_v9  ;;  %v768_v61 = vmul.f32 %v732_v52, %v672_v10  ;;  %v765_v25 = vmul.f32 %v729_v54, %v669_v17  ;;  %v766_v23 = vmul.f32 %v730_v55, %v671_v21  ;;  %v723_v54 = vld [vmem:[%s2265_s0 + $0x70] sm:$0xff]  ;;  %v724_v55 = vld [vmem:[%s2265_s0 + $0x78] sm:$0xff] }
 0x1fa   : >> { %v791_v35 = vpack.c.bf16 %v767_v22, %v765_v25  ;;  %v792_v18 = vpack.c.bf16 %v768_v61, %v766_v23  ;;  %v717_v22 = vld [vmem:[%s2265_s0 + $0x40] sm:$0xff]  ;;  %v718_v61 = vld [vmem:[%s2265_s0 + $0x48] sm:$0xff]  ;;  %v720_v25 = vld [vmem:[%s2265_s0 + $0x58] sm:$0xff] }
 0x1fc   : >> { %823 = vmatpush.bf16.msra.mxu0 %v791_v35  ;;  %851 = vmatpush.bf16.msra.mxu2 %v792_v18 }
 0x1fe   : >> { %v650_v43 = vpop.permute.xlu0 %649  ;;  %v652_v24 = vpop.permute.xlu1 %651 }
 0x1ff   : >> { %v657_v42 = vsel %vm364_vm3, %v650_v43, %v654_v56  ;;  %v659_v52 = vsel %vm364_vm3, %v654_v56, %v650_v43  ;;  %v626_v21 = vpop.permute.xlu2 %625 }
 0x200   : >> { %824 = vmatpush.bf16.msra.mxu0 %v789_v34  ;;  %852 = vmatpush.bf16.msra.mxu2 %v790_v26  ;;  %v757_v2 = vmul.f32 %v721_v27, %v659_v52  ;;  %v758_v3 = vmul.f32 %v722_v53, %v657_v42 }
 0x206   : >> { %v656_v57 = vpop.permute.xlu0 %655  ;;  %v638_v58 = vpop.permute.xlu1 %637 }
 0x207   : >> { %v658_v59 = vsel %vm364_vm3, %v652_v24, %v656_v57  ;;  %v660_v0 = vsel %vm364_vm3, %v656_v57, %v652_v24  ;;  %v719_v24 = vld [vmem:[%s2265_s0 + $0x50] sm:$0xff] }
 0x208   : >> { %v759_v9 = vmul.f32 %v723_v54, %v660_v0  ;;  %v760_v56 = vmul.f32 %v724_v55, %v658_v59  ;;  %v715_v57 = vld [vmem:[%s2265_s0 + $0x30] sm:$0xff]  ;;  %v716_v59 = vld [vmem:[%s2265_s0 + $0x38] sm:$0xff]  ;;  %v714_v0 = vld [vmem:[%s2265_s0 + $0x28] sm:$0xff] }
 0x20a   : >> { %v787_v10 = vpack.c.bf16 %v759_v9, %v757_v2  ;;  %v788_v17 = vpack.c.bf16 %v760_v56, %v758_v3 }
 0x20c   : >> { %825 = vmatpush.bf16.msra.mxu0 %v787_v10  ;;  %853 = vmatpush.bf16.msra.mxu2 %v788_v17 }
 0x20e   : >> { %v642_v23 = vpop.permute.xlu0 %641  ;;  %v644_v35 = vpop.permute.xlu1 %643 }
 0x20f   : >> { %v645_v18 = vsel %vm351_vm4, %v638_v58, %v642_v23  ;;  %v647_v34 = vsel %vm351_vm4, %v642_v23, %v638_v58  ;;  %v646_v26 = vsel %vm351_vm4, %v640_v6, %v644_v35  ;;  %v648_v43 = vsel %vm351_vm4, %v644_v35, %v640_v6  ;;  %v632_v58 = vpop.permute.xlu2 %631  ;;  %v713_v6 = vld [vmem:[%s2265_s0 + $0x20] sm:$0xff]  ;;  %v612_v23 = vld [vmem:[%s610_s25 + $0x8] sm:$0xff] }
 0x210   : >> { %v753_v27 = vmul.f32 %v717_v22, %v647_v34  ;;  %v754_v53 = vmul.f32 %v718_v61, %v645_v18  ;;  %v755_v42 = vmul.f32 %v719_v24, %v648_v43  ;;  %v756_v52 = vmul.f32 %v720_v25, %v646_v26  ;;  %v611_v35 = vld [vmem:[%s610_s25] sm:$0xff] }
 0x211   : >> { %v1357_v26 = vmov 0  }
 0x212   : >> { %v785_v54 = vpack.c.bf16 %v755_v42, %v753_v27  ;;  %v786_v55 = vpack.c.bf16 %v756_v52, %v754_v53  ;;  %1289 = vset.pattern.permute.xlu0 %v1357_v26  ;;  %1288 = vset.pattern.permute.xlu2 %v1357_v26  ;;  %v710_v42 = vld [vmem:[%s2265_s0 + $0x8] sm:$0xff] }
 0x213   : >> { %806 = vperm.xlu0 %1289, %v612_v23   ;;  %801 = vperm.xlu2 %1288, %v611_v35   ;;  %v743_v23 = vld [vmem:[%s2265_s0 + $0x110] sm:$0xff]  ;;  %v744_v35 = vld [vmem:[%s2265_s0 + $0x118] sm:$0xff] }
 0x214   : >> { %826 = vmatpush.bf16.msra.mxu0 %v785_v54  ;;  %854 = vmatpush.bf16.msra.mxu2 %v786_v55  ;;  %v711_v55 = vld [vmem:[%s2265_s0 + $0x10] sm:$0xff] }
 0x216   : >> { %v628_v2 = vpop.permute.xlu0 %627  ;;  %v630_v3 = vpop.permute.xlu1 %629 }
 0x217   : >> { %v634_v9 = vsel %vm338_vm5, %v628_v2, %v632_v58  ;;  %v636_v56 = vsel %vm338_vm5, %v632_v58, %v628_v2  ;;  %v633_v10 = vsel %vm338_vm5, %v626_v21, %v630_v3  ;;  %v635_v17 = vsel %vm338_vm5, %v630_v3, %v626_v21  ;;  %v618_v53 = vpop.permute.xlu2 %617  ;;  %v709_v21 = vld [vmem:[%s2265_s0] sm:$0xff] }
 0x218   : >> { %v751_v22 = vmul.f32 %v715_v57, %v636_v56  ;;  %v752_v61 = vmul.f32 %v716_v59, %v634_v9  ;;  %v749_v24 = vmul.f32 %v713_v6, %v635_v17  ;;  %v750_v25 = vmul.f32 %v714_v0, %v633_v10  ;;  %v712_v57 = vld [vmem:[%s2265_s0 + $0x18] sm:$0xff]  ;;  %v1201_v10 = vld [vmem:[%s2027_s26] sm:$0xf]  ;;  %v1219_v17 = vld [vmem:[%s2027_s26 + $0x4] sm:$0xf0] }
 0x21a   : >> { %v783_v18 = vpack.c.bf16 %v751_v22, %v749_v24  ;;  %v784_v34 = vpack.c.bf16 %v752_v61, %v750_v25  ;;  %v1202_v24 = vor.u32 %v1219_v17, %v1201_v10 }
 0x21c   : >> { %827 = vmatpush.bf16.msra.mxu0 %v783_v18  ;;  %855 = vmatpush.bf16.msra.mxu2 %v784_v34  ;;  %v741_v18 = vld [vmem:[%s2265_s0 + $0x100] sm:$0xff]  ;;  %v742_v34 = vld [vmem:[%s2265_s0 + $0x108] sm:$0xff] }
 0x21e   : >> { %v614_v43 = vpop.permute.xlu0 %613  ;;  %v616_v27 = vpop.permute.xlu1 %615 }
 0x21f   : >> { %v621_v52 = vsel %vm325_vm6, %v614_v43, %v618_v53  ;;  %v623_v54 = vsel %vm325_vm6, %v618_v53, %v614_v43  ;;  %v700_v25 = vpop.permute.xlu2 %699 }
 0x220   : >> { %v745_v2 = vmul.f32 %v709_v21, %v623_v54  ;;  %v746_v3 = vmul.f32 %v710_v42, %v621_v52 }
 0x226   : >> { %v620_v58 = vpop.permute.xlu0 %619  ;;  %v698_v59 = vpop.permute.xlu1 %697 }
 0x227   : >> { %v622_v6 = vsel %vm325_vm6, %v616_v27, %v620_v58  ;;  %v624_v0 = vsel %vm325_vm6, %v620_v58, %v616_v27  ;;  %v1218_v58 = vld [vmem:[%s2027_s26 + $0x4] sm:$0xf] }
 0x228   : >> { %v747_v9 = vmul.f32 %v711_v55, %v624_v0  ;;  %v748_v56 = vmul.f32 %v712_v57, %v622_v6  ;;  %v1203_v6 = vld [vmem:[%s2027_s26 + $0x8] sm:$0xf0] }
 0x22a   : >> { %v781_v22 = vpack.c.bf16 %v747_v9, %v745_v2  ;;  %v782_v61 = vpack.c.bf16 %v748_v56, %v746_v3  ;;  %v1206_v3 = vor.u32 %v1218_v58, %v1203_v6 }
 0x22c   : >> { %828 = vmatpush.bf16.msra.mxu0 %v781_v22  ;;  %856 = vmatpush.bf16.msra.mxu2 %v782_v61 }
 0x22e   : >> { %v702_v26 = vpop.permute.xlu0 %701  ;;  %v704_v43 = vpop.permute.xlu1 %703 }
 0x22f   : >> { %v705_v27 = vsel %vm416_vm7, %v698_v59, %v702_v26  ;;  %v707_v53 = vsel %vm416_vm7, %v702_v26, %v698_v59  ;;  %v706_v21 = vsel %vm416_vm7, %v700_v25, %v704_v43  ;;  %v708_v42 = vsel %vm416_vm7, %v704_v43, %v700_v25  ;;  %857 = vmatmul.bf16.vlgmr.msra.gmra.mxu2 %v1202_v24 }
 0x230   : >> { %v779_v52 = vmul.f32 %v743_v23, %v706_v21  ;;  %v780_v54 = vmul.f32 %v744_v35, %v708_v42  ;;  %829 = vmatmul.bf16.vlgmr.msra.gmra.mxu0 %v1202_v24  ;;  %v777_v55 = vmul.f32 %v741_v18, %v705_v27  ;;  %v778_v57 = vmul.f32 %v742_v34, %v707_v53 }
 0x232   : >> { %v797_v0 = vpack.c.bf16 %v779_v52, %v777_v55  ;;  %v798_v2 = vpack.c.bf16 %v780_v54, %v778_v57  ;;  %v2284_v57 = vmov (%p596_p4), 0  }
 0x233   : > { %1291 = vset.pattern.permute.xlu0 (%p596_p4), %v2284_v57  ;;  %1290 = vset.pattern.permute.xlu2 (%p596_p4), %v2284_v57 }
 0x234   : >> { %842 = vmatpush.bf16.msra.mxu1 %v797_v0  ;;  %870 = vmatpush.bf16.msra.mxu3 %v798_v2 }
 0x237   : >> { %1207 = vmatmul.msk.bf16.vlgmr.msra.gmra.mxu1 %vm530_vm8, %v1206_v3  ;;  %1208 = vmatmul.msk.bf16.vlgmr.msra.gmra.mxu3 %vm530_vm8, %v1206_v3 }
 0x26d   : >> { %v802_v9 = vpop.permute.xlu2 %801 }
 0x285   : >> { %v807_v25 = vpop.permute.xlu0 %806 }
 0x2ad   : >> { %v830_v59 = vpop.f32.mrf.mxu0 }
 0x2ae   : >> { %v831_v56 = vadd.f32 %v830_v59, %v802_v9 }
 0x2b2   : >> { %v858_v10 = vpop.f32.mrf.mxu2 }
 0x2b3   : >> { %v859_v61 = vadd.f32 %v858_v10, %v802_v9 }
 0x2b4   : >> { %v844_v17 = vpop.f32.mrf.mxu1 }
 0x2b5   : >> { %v845_v22 = vadd.f32 %v844_v17, %v831_v56  ;;  %v832_v23 = vpop.f32.mrf.mxu0 }
 0x2b6   : >> { %v833_v18 = vadd.f32 %v832_v23, %v807_v25 }
 0x2b7   : >> { %v2059_v24 = vmax.f32 %v845_v22, 0.0  }
 0x2b9   : > { %955 = vrot.lane.b32.xlu0 (%p596_p4), %v2059_v24, %s1340_s15  ;;  %943 = vrot.lane.b32.xlu2 (%p596_p4), %v2059_v24, %s1341_s16 }
 0x2ba   : >> { %v872_v35 = vpop.f32.mrf.mxu3  ;;  %v860_v53 = vpop.f32.mrf.mxu2 }
 0x2bb   : >> { %v873_v34 = vadd.f32 %v872_v35, %v859_v61  ;;  %v861_v42 = vadd.f32 %v860_v53, %v807_v25  ;;  %v2283_v61 = vmov %v2059_v24 }
 0x2bc   : >> { %v846_v26 = vpop.f32.mrf.mxu1 }
 0x2bd   : >> { %v2061_v43 = vmax.f32 %v873_v34, 0.0   ;;  %v847_v27 = vadd.f32 %v846_v26, %v833_v18 }
 0x2bf   : >> { %v2063_v23 = vmax.f32 %v847_v27, 0.0   ;;  %v2282_v18 = vmov %v2061_v43  ;;  %959 = vrot.lane.b32.xlu1 (%p596_p4), %v2061_v43, %s1340_s15 }
 0x2c1   : >> { %v2278_v21 = vmov %v2063_v23 }
 0x2c2   : >> { %v874_v52 = vpop.f32.mrf.mxu3  ;;  %v2281_v23 = vmov %v2278_v21  ;;  %957 = vrot.lane.b32.xlu0 (%p596_p4), %v2278_v21, %s1340_s15  ;;  %945 = vrot.lane.b32.xlu2 (%p596_p4), %v2278_v21, %s1341_s16 }
 0x2c3   : >> { %v875_v54 = vadd.f32 %v874_v52, %v861_v42 }
 0x2c4   : > { %598 = sbr.rel (!%p596_p4) target bundleno = 363 (0x16b), region = 91 }
 0x2c5   : >> { %v2065_v34 = vmax.f32 %v875_v54, 0.0  }
 0x2c7   : >> { %v2279_v55 = vmov %v2065_v34 }
 0x2c8   : >> { %v2280_v34 = vmov %v2279_v55  ;;  %961 = vrot.lane.b32.xlu1 (%p596_p4), %v2279_v55, %s1340_s15 }
 0x2ca   : > { %947 = vrot.lane.b32.xlu0 %v2061_v43, %s1341_s16  ;;  %931 = vrot.lane.b32.xlu2 %v2059_v24, %s1342_s17 }
 0x2d0   : > { %949 = vrot.lane.b32.xlu1 %v2279_v55, %s1341_s16 }
 0x2d2   : > { %933 = vrot.lane.b32.xlu0 %v2278_v21, %s1342_s17  ;;  %937 = vrot.lane.b32.xlu2 %v2279_v55, %s1342_s17 }
 0x2d8   : > { %935 = vrot.lane.b32.xlu1 %v2061_v43, %s1342_s17 }
 0x2da   : > { %919 = vrot.lane.b32.xlu0 %v2059_v24, %s1343_s18  ;;  %923 = vrot.lane.b32.xlu2 %v2061_v43, %s1343_s18 }
 0x2e0   : > { %921 = vrot.lane.b32.xlu1 %v2278_v21, %s1343_s18 }
 0x2e2   : > { %925 = vrot.lane.b32.xlu0 %v2279_v55, %s1343_s18  ;;  %909 = vrot.lane.b32.xlu2 %v2278_v21, %s1344_s19 }
 0x2e8   : > { %907 = vrot.lane.b32.xlu1 %v2059_v24, %s1344_s19 }
 0x2ea   : > { %911 = vrot.lane.b32.xlu0 %v2061_v43, %s1344_s19  ;;  %895 = vrot.lane.b32.xlu2 %v2059_v24, %s1345_s20 }
 0x2f0   : > { %913 = vrot.lane.b32.xlu1 %v2279_v55, %s1344_s19 }
 0x2f2   : > { %897 = vrot.lane.b32.xlu0 %v2278_v21, %s1345_s20  ;;  %901 = vrot.lane.b32.xlu2 %v2279_v55, %s1345_s20 }
 0x2f8   : > { %899 = vrot.lane.b32.xlu1 %v2061_v43, %s1345_s20 }
 0x2fa   : > { %883 = vrot.lane.b32.xlu0 %v2059_v24, %s1346_s21  ;;  %887 = vrot.lane.b32.xlu2 %v2061_v43, %s1346_s21 }
 0x300   : > { %885 = vrot.lane.b32.xlu1 %v2278_v21, %s1346_s21 }
 0x302   : > { %889 = vrot.lane.b32.xlu0 %v2279_v55, %s1346_s21  ;;  %969 = vrot.lane.b32.xlu2 %v2278_v21, %s1347_s22 }
 0x308   : > { %967 = vrot.lane.b32.xlu1 %v2059_v24, %s1347_s22 }
 0x30a   : > { %971 = vrot.lane.b32.xlu0 %v2061_v43, %s1347_s22 }
 0x310   : > { %973 = vrot.lane.b32.xlu1 %v2279_v55, %s1347_s22 }
 0x313   : > { %v944_v58 = vpop.permute.xlu2 %943 }
 0x31c   : > { %v946_v6 = vpop.permute.xlu2 %945 }
 0x324   : > { %v932_v3 = vpop.permute.xlu2 %931 }
 0x32b   : > { %v956_v2 = vpop.permute.xlu0 %955 }
 0x32c   : > { %v938_v26 = vpop.permute.xlu2 %937 }
 0x331   : > { %v960_v0 = vpop.permute.xlu1 %959 }
 0x332   : > { %v963_v59 = vsel %vm403_vm0, %v956_v2, %v960_v0  ;;  %v965_v9 = vsel %vm403_vm0, %v960_v0, %v956_v2 }
 0x333   : > { %v1007_v61 = vmul.f32 %v963_v59, %v1497_v11  ;;  %v1008_v23 = vmul.f32 %v965_v9, %v1511_v15 }
 0x334   : > { %v958_v10 = vpop.permute.xlu0 %957  ;;  %v924_v59 = vpop.permute.xlu2 %923 }
 0x33a   : > { %v962_v56 = vpop.permute.xlu1 %961 }
 0x33b   : > { %v964_v17 = vsel %vm403_vm0, %v958_v10, %v962_v56  ;;  %v966_v22 = vsel %vm403_vm0, %v962_v56, %v958_v10  ;;  %v995_v56 = vmul.f32 %v2059_v24, %v1562_v44 }
 0x33c   : > { %v1009_v25 = vmul.f32 %v964_v17, %v1506_v14  ;;  %v1010_v35 = vmul.f32 %v966_v22, %v1516_v16  ;;  %v948_v53 = vpop.permute.xlu0 %947 }
 0x33d   : > { %v951_v11 = vsel %vm390_vm1, %v944_v58, %v948_v53  ;;  %v953_v14 = vsel %vm390_vm1, %v948_v53, %v944_v58  ;;  %v997_v58 = vmul.f32 %v2278_v21, %v1567_v45 }
 0x33e   : > { %v1029_v18 = vpack.c.bf16 %v1009_v25, %v1007_v61  ;;  %v1030_v34 = vpack.c.bf16 %v1010_v35, %v1008_v23  ;;  %v1003_v54 = vmul.f32 %v951_v11, %v1540_v30  ;;  %v1004_v57 = vmul.f32 %v953_v14, %v1545_v31  ;;  %v910_v61 = vpop.permute.xlu2 %909 }
 0x340   : > { %1047 = vmatpush.bf16.msra.mxu0 %v1029_v18  ;;  %1073 = vmatpush.bf16.msra.mxu2 %v1030_v34 }
 0x342   : > { %v950_v27 = vpop.permute.xlu1 %949 }
 0x343   : > { %v952_v42 = vsel %vm390_vm1, %v946_v6, %v950_v27  ;;  %v954_v52 = vsel %vm390_vm1, %v950_v27, %v946_v6 }
 0x344   : > { %v1005_v15 = vmul.f32 %v952_v42, %v1530_v28  ;;  %v1006_v16 = vmul.f32 %v954_v52, %v1535_v29  ;;  %v934_v9 = vpop.permute.xlu0 %933  ;;  %v996_v28 = vmul.f32 %v2061_v43, %v1572_v46  ;;  %v998_v29 = vmul.f32 %v2279_v55, %v1577_v47 }
 0x345   : > { %v940_v10 = vsel %vm377_vm2, %v934_v9, %v938_v26  ;;  %v942_v44 = vsel %vm377_vm2, %v938_v26, %v934_v9  ;;  %v1023_v55 = vpack.c.bf16 %v997_v58, %v995_v56 }
 0x346   : > { %v1027_v0 = vpack.c.bf16 %v1005_v15, %v1003_v54  ;;  %v1028_v2 = vpack.c.bf16 %v1006_v16, %v1004_v57  ;;  %v1001_v46 = vmul.f32 %v940_v10, %v1593_v50  ;;  %v1002_v47 = vmul.f32 %v942_v44, %v1598_v51  ;;  %v896_v42 = vpop.permute.xlu2 %895 }
 0x348   : > { %1048 = vmatpush.bf16.msra.mxu0 %v1027_v0  ;;  %1074 = vmatpush.bf16.msra.mxu2 %v1028_v2 }
 0x34a   : > { %v936_v6 = vpop.permute.xlu1 %935 }
 0x34b   : > { %v939_v30 = vsel %vm377_vm2, %v932_v3, %v936_v6  ;;  %v941_v31 = vsel %vm377_vm2, %v936_v6, %v932_v3  ;;  %v1024_v3 = vpack.c.bf16 %v998_v29, %v996_v28 }
 0x34c   : > { %v999_v45 = vmul.f32 %v939_v30, %v1583_v48  ;;  %v1000_v24 = vmul.f32 %v941_v31, %v1588_v49  ;;  %v920_v22 = vpop.permute.xlu0 %919 }
 0x34d   : > { %v927_v48 = vsel %vm364_vm3, %v920_v22, %v924_v59  ;;  %v929_v49 = vsel %vm364_vm3, %v924_v59, %v920_v22 }
 0x34e   : > { %v1025_v43 = vpack.c.bf16 %v1001_v46, %v999_v45  ;;  %v1026_v21 = vpack.c.bf16 %v1002_v47, %v1000_v24  ;;  %v991_v35 = vmul.f32 %v929_v49, %v1624_v12  ;;  %v992_v18 = vmul.f32 %v927_v48, %v1629_v13  ;;  %v902_v2 = vpop.permute.xlu2 %901  ;;  %v881_v24 = vld [vmem:[%s2271_s6] sm:$0xff] }
 0x350   : > { %1049 = vmatpush.bf16.msra.mxu0 %v1025_v43  ;;  %1075 = vmatpush.bf16.msra.mxu2 %v1026_v21  ;;  %v1039_v43 = vunpack.c.l.b16 %v881_v24 }
 0x352   : > { %v922_v17 = vpop.permute.xlu1 %921  ;;  %v1041_v48 = vpack.c.b16 %v1039_v43, %v1039_v43 }
 0x354   : > { %1050 = vmatpush.bf16.msra.mxu0 %v1023_v55  ;;  %1076 = vmatpush.bf16.msra.mxu2 %v1024_v3  ;;  %v926_v25 = vpop.permute.xlu0 %925 }
 0x355   : > { %v928_v51 = vsel %vm364_vm3, %v922_v17, %v926_v25  ;;  %v930_v23 = vsel %vm364_vm3, %v926_v25, %v922_v17 }
 0x356   : > { %v993_v34 = vmul.f32 %v930_v23, %v1638_v19  ;;  %v994_v26 = vmul.f32 %v928_v51, %v1643_v20  ;;  %v888_v45 = vpop.permute.xlu2 %887  ;;  %v1040_v51 = vunpack.c.h.b16 %v881_v24 }
 0x358   : > { %v1021_v27 = vpack.c.bf16 %v993_v34, %v991_v35  ;;  %v1022_v53 = vpack.c.bf16 %v994_v26, %v992_v18  ;;  %v2285_v34 = vld [vmem:[#allocation2_spill] sm:$0xff] }
 0x35a   : > { %v908_v50 = vpop.permute.xlu1 %907  ;;  %1051 = vmatpush.bf16.msra.mxu0 %v1021_v27  ;;  %1077 = vmatpush.bf16.msra.mxu2 %v1022_v53 }
 0x35c   : > { %v912_v11 = vpop.permute.xlu0 %911 }
 0x35d   : > { %v915_v12 = vsel %vm351_vm4, %v908_v50, %v912_v11  ;;  %v917_v13 = vsel %vm351_vm4, %v912_v11, %v908_v50 }
 0x35e   : > { %v987_v16 = vmul.f32 %v917_v13, %v1667_v38  ;;  %v988_v54 = vmul.f32 %v915_v12, %v1672_v39  ;;  %v882_v38 = vld [vmem:[%s2272_s7] sm:$0xff]  ;;  %v970_v49 = vpop.permute.xlu2 %969 }
 0x35f   : > { %1035 = vperm.xlu2 %1290, %v882_v38  }
 0x362   : > { %v914_v52 = vpop.permute.xlu1 %913 }
 0x363   : > { %v916_v14 = vsel %vm351_vm4, %v910_v61, %v914_v52  ;;  %v918_v15 = vsel %vm351_vm4, %v914_v52, %v910_v61 }
 0x364   : > { %v989_v19 = vmul.f32 %v918_v15, %v1657_v36  ;;  %v990_v20 = vmul.f32 %v916_v14, %v1662_v37  ;;  %v898_v6 = vpop.permute.xlu0 %897 }
 0x365   : > { %v904_v36 = vsel %vm338_vm5, %v898_v6, %v902_v2  ;;  %v906_v37 = vsel %vm338_vm5, %v902_v2, %v898_v6 }
 0x366   : > { %v1019_v57 = vpack.c.bf16 %v989_v19, %v987_v16  ;;  %v1020_v0 = vpack.c.bf16 %v990_v20, %v988_v54  ;;  %v985_v28 = vmul.f32 %v906_v37, %v1700_v63  ;;  %v986_v29 = vmul.f32 %v904_v36, %v1705_v1 }
 0x368   : > { %1052 = vmatpush.bf16.msra.mxu0 %v1019_v57  ;;  %1078 = vmatpush.bf16.msra.mxu2 %v1020_v0 }
 0x36a   : > { %v900_v59 = vpop.permute.xlu1 %899 }
 0x36b   : > { %v903_v9 = vsel %vm338_vm5, %v896_v42, %v900_v59  ;;  %v905_v56 = vsel %vm338_vm5, %v900_v59, %v896_v42  ;;  %v1042_v42 = vpack.c.b16 %v1040_v51, %v1040_v51 }
 0x36c   : > { %v983_v39 = vmul.f32 %v905_v56, %v1690_v60  ;;  %v984_v58 = vmul.f32 %v903_v9, %v1695_v62  ;;  %v884_v44 = vpop.permute.xlu0 %883 }
 0x36d   : > { %v891_v60 = vsel %vm325_vm6, %v884_v44, %v888_v45  ;;  %v893_v62 = vsel %vm325_vm6, %v888_v45, %v884_v44 }
 0x36e   : > { %v1017_v30 = vpack.c.bf16 %v985_v28, %v983_v39  ;;  %v1018_v31 = vpack.c.bf16 %v986_v29, %v984_v58  ;;  %v979_v21 = vmul.f32 %v893_v62, %v1731_v32  ;;  %v980_v55 = vmul.f32 %v891_v60, %v1736_v33 }
 0x370   : > { %1053 = vmatpush.bf16.msra.mxu0 %v1017_v30  ;;  %1079 = vmatpush.bf16.msra.mxu2 %v1018_v31 }
 0x372   : > { %v886_v10 = vpop.permute.xlu1 %885 }
 0x374   : > { %v890_v1 = vpop.permute.xlu0 %889 }
 0x375   : > { %v892_v46 = vsel %vm325_vm6, %v886_v10, %v890_v1  ;;  %v894_v47 = vsel %vm325_vm6, %v890_v1, %v886_v10 }
 0x376   : > { %v981_v3 = vmul.f32 %v894_v47, %v1745_v40  ;;  %v982_v17 = vmul.f32 %v892_v46, %v1750_v41 }
 0x378   : > { %v1015_v22 = vpack.c.bf16 %v981_v3, %v979_v21  ;;  %v1016_v61 = vpack.c.bf16 %v982_v17, %v980_v55 }
 0x37a   : > { %v968_v63 = vpop.permute.xlu1 %967  ;;  %1054 = vmatpush.bf16.msra.mxu0 %v1015_v22  ;;  %1080 = vmatpush.bf16.msra.mxu2 %v1016_v61 }
 0x37c   : > { %v972_v25 = vpop.permute.xlu0 %971 }
 0x37d   : > { %v975_v33 = vsel %vm416_vm7, %v968_v63, %v972_v25  ;;  %v977_v40 = vsel %vm416_vm7, %v972_v25, %v968_v63  ;;  %1081 = vmatmul.bf16.vlgmr.msra.gmra.mxu2 %v1041_v48  ;;  %1055 = vmatmul.bf16.vlgmr.msra.gmra.mxu0 %v1041_v48 }
 0x37e   : > { %v1011_v18 = vmul.f32 %v975_v33, %v1770_v4  ;;  %v1012_v26 = vmul.f32 %v977_v40, %v2285_v34 }
 0x382   : > { %v974_v50 = vpop.permute.xlu1 %973 }
 0x383   : > { %v976_v23 = vsel %vm416_vm7, %v970_v49, %v974_v50  ;;  %v978_v32 = vsel %vm416_vm7, %v974_v50, %v970_v49 }
 0x384   : > { %v1013_v41 = vmul.f32 %v976_v23, %v1775_v5  ;;  %v1014_v35 = vmul.f32 %v978_v32, %v1785_v7 }
 0x386   : > { %v1031_v27 = vpack.c.bf16 %v1013_v41, %v1011_v18  ;;  %v1032_v53 = vpack.c.bf16 %v1014_v35, %v1012_v26 }
 0x388   : > { %1067 = vmatpush.bf16.msra.mxu1 %v1031_v27  ;;  %1093 = vmatpush.bf16.msra.mxu3 %v1032_v53 }
 0x38b   : > { %1209 = vmatmul.msk.bf16.vlgmr.msra.gmra.mxu1 %vm530_vm8, %v1042_v42  ;;  %1210 = vmatmul.msk.bf16.vlgmr.msra.gmra.mxu3 %vm530_vm8, %v1042_v42 }
 0x3b9   : > { %v1036_v5 = vpop.permute.xlu2 %1035 }
 0x3fa   : > { %v1056_v8 = vpop.f32.mrf.mxu0 }
 0x3fb   : > { %v1057_v52 = vadd.f32 %v1056_v8, %v1036_v5 }
 0x400   : > { %v1082_v7 = vpop.f32.mrf.mxu2 }
 0x401   : > { %v1083_v15 = vadd.f32 %v1082_v7, %v1036_v5 }
 0x402   : > { %v1058_v14 = vpop.f32.mrf.mxu0 }
 0x408   : > { %v1069_v11 = vpop.f32.mrf.mxu1  ;;  %v1084_v12 = vpop.f32.mrf.mxu2 }
 0x409   : > { %v1070_v4 = vadd.f32 %v1069_v11, %v1057_v52 }
 0x40b   : > { %1099 = vst [vmem:[%s1417_s14] sm:$0xff] %v1070_v4 }
 0x40e   : > { %v1095_v13 = vpop.f32.mrf.mxu3 }
 0x40f   : > { %v1096_v19 = vadd.f32 %v1095_v13, %v1083_v15 }
 0x410   : > { %v1071_v20 = vpop.f32.mrf.mxu1 }
 0x411   : > { %1100 = vst [vmem:[%s1417_s14 + $0x8] sm:$0xff] %v1096_v19 }
 0x416   : > { %v1097_v16 = vpop.f32.mrf.mxu3 }
 0x417 PF: > { %s18_s27 = sadd.s32 1, %s1318_s27  }
 0x418   : > { %p15_p5 = scmp.ge.s32.totalorder %s18_s27, 4  }
 0x41a   :  { %17 = sbr.rel (!%p15_p5) target bundleno = 1 (0x1), region = 102 }

</bundles_post_ra>
